<compile_context>
chip_gen: v6e
topology: v6e:2x2x1
jax: 0.10.0
libtpu: 0.0.40
codegen_flags: <defaults>
</compile_context>

<pallas_src>
import functools

import jax
import jax.numpy as jnp
import numpy as np
from jax import lax
from jax.experimental import pallas as pl
from jax.experimental.pallas import tpu as pltpu


# ----------------------------------------------------------------------------
# Pallas kernel: one grid step = one LSTM direction over the whole sequence.
# ----------------------------------------------------------------------------
def _lstm_recurrence_kernel(gx_ref, whh_ref, h0_ref, c0_ref, out_ref,
                            *, seq_len, hidden, unroll):
    """Serial LSTM recurrence for one direction (both sequences stacked in batch).

    gx_ref : (T, B', 4H) f32   precomputed x @ W_ih^T + (b_ih + b_hh)
    whh_ref: (H, 4H)     bf16  recurrent weight, transposed
    h0_ref : (B', H)     f32
    c0_ref : (B', H)     f32
    out_ref: (T, B', H)  f32   hidden state per time step (natural time order)

    Direction 1 (pl.program_id(0) == 1) walks time in reverse; outputs are
    written back at their true time index, so no reversal is needed outside.
    """
    reverse = pl.program_id(0) == 1

    whh = whh_ref[...]                         # (H, 4H) bf16, loaded once
    h0 = h0_ref[...].astype(jnp.float32)
    c0 = c0_ref[...].astype(jnp.float32)

    def step(s, carry):
        h, c = carry
        t = jnp.where(reverse, seq_len - 1 - s, s)      # dynamic time index
        gx = gx_ref[t]                                   # (B', 4H) f32
        gates = gx + jnp.dot(h.astype(whh.dtype), whh,
                             preferred_element_type=jnp.float32)
        # PyTorch gate order: i, f, g, o
        i_g = jax.nn.sigmoid(gates[:, 0 * hidden:1 * hidden])
        f_g = jax.nn.sigmoid(gates[:, 1 * hidden:2 * hidden])
        g_g = jnp.tanh(gates[:, 2 * hidden:3 * hidden])
        o_g = jax.nn.sigmoid(gates[:, 3 * hidden:4 * hidden])
        c_new = f_g * c + i_g * g_g
        h_new = o_g * jnp.tanh(c_new)
        out_ref[t] = h_new.astype(out_ref.dtype)
        return (h_new, c_new)

    lax.fori_loop(0, seq_len, step, (h0, c0), unroll=unroll)


def lstm_layer_fused(gates_x, whh_t, h0, c0, *, unroll):
    """Run both directions of one (bi)LSTM layer in a single pallas_call.

    gates_x : [2, T, B', 4H] f32   per-direction precomputed input projections
    whh_t   : [2, H, 4H]     bf16  per-direction recurrent weights (transposed)
    h0, c0  : [2, B', H]     f32
    returns : [2, T, B', H]  f32
    """
    D, T, Bp, G = gates_x.shape
    H = h0.shape[-1]
    kernel = functools.partial(_lstm_recurrence_kernel,
                               seq_len=T, hidden=H, unroll=unroll)
    return pl.pallas_call(
        kernel,
        out_shape=jax.ShapeDtypeStruct((D, T, Bp, H), jnp.float32),
        grid_spec=pltpu.PrefetchScalarGridSpec(
            num_scalar_prefetch=0,
            grid=(D,),                                       # 2 directions
            in_specs=[
                pl.BlockSpec((None, T, Bp, G), lambda d: (d, 0, 0, 0)),  # gates_x
                pl.BlockSpec((None, H, G), lambda d: (d, 0, 0)),         # W_hh^T
                pl.BlockSpec((None, Bp, H), lambda d: (d, 0, 0)),        # h0
                pl.BlockSpec((None, Bp, H), lambda d: (d, 0, 0)),        # c0
            ],
            out_specs=pl.BlockSpec((None, T, Bp, H), lambda d: (d, 0, 0, 0)),
        ),
        compiler_params=pltpu.CompilerParams(
            # directions are independent -> may shard across v7x's 2 TensorCores
            dimension_semantics=("parallel",)),
    )(gates_x, whh_t, h0, c0)


# ----------------------------------------------------------------------------
# Model: parameter construction + forward (mirrors TextBiLSTM.forward, eval mode)
# ----------------------------------------------------------------------------
class TextBiLSTMPallas:
    def __init__(self, config, key):
        self.word2id = config["word2id"]
        self.vocabulary_size = len(self.word2id) + 1
        self.embedding_size = config["embedding_size"]
        self.hidden_size = config["hidden_size"]
        self.layer_num = config["layer_num"]

        E, H, L = self.embedding_size, self.hidden_size, self.layer_num
        keys = jax.random.split(key, 1 + 8 * L)

        # nn.Embedding default init: N(0, 1); row 0 (padding) set to zero.
        emb = jax.random.normal(keys[0], (self.vocabulary_size, E), jnp.float32)
        self.embedding = emb.at[0].set(0.0)
        # TODO(synk): load_pretrained_embeddings (file I/O) not translated; random init used.

        # nn.LSTM default init: U(-1/sqrt(H), 1/sqrt(H)) for every parameter.
        stdv = 1.0 / np.sqrt(H)
        self.layers = []
        kidx = 1
        for layer in range(L):
            in_size = E if layer == 0 else 2 * H
            wih_t, whh_t, bias = [], [], []
            for _d in range(2):                               # 0 = fwd, 1 = bwd
                w_ih = jax.random.uniform(keys[kidx + 0], (4 * H, in_size),
                                          jnp.float32, -stdv, stdv)
                w_hh = jax.random.uniform(keys[kidx + 1], (4 * H, H),
                                          jnp.float32, -stdv, stdv)
                b_ih = jax.random.uniform(keys[kidx + 2], (4 * H,),
                                          jnp.float32, -stdv, stdv)
                b_hh = jax.random.uniform(keys[kidx + 3], (4 * H,),
                                          jnp.float32, -stdv, stdv)
                kidx += 4
                wih_t.append(w_ih.T)                          # (in_size, 4H)
                whh_t.append(w_hh.T)                          # (H, 4H)
                bias.append(b_ih + b_hh)                      # (4H,)
            self.layers.append({
                # bf16 matmul operands (MXU-native on v5e/v6e/v7x); f32 accumulation.
                "wih_t": jnp.stack(wih_t).astype(jnp.bfloat16),   # [2, in, 4H]
                "whh_t": jnp.stack(whh_t).astype(jnp.bfloat16),   # [2, H, 4H]
                "bias": jnp.stack(bias),                          # [2, 4H] f32
            })

    def __call__(self, X_q_inputs, X_r_inputs, q_init_state, r_init_state):
        q_emb = jnp.take(self.embedding, X_q_inputs, axis=0)   # [B, T, E]
        r_emb = jnp.take(self.embedding, X_r_inputs, axis=0)
        B = q_emb.shape[0]

        # Both sequences share the LSTM weights -> stack along batch: [T, 2B, E]
        x = jnp.concatenate([jnp.transpose(q_emb, (1, 0, 2)),
                             jnp.transpose(r_emb, (1, 0, 2))], axis=1)
        q_h0, q_c0 = q_init_state
        r_h0, r_c0 = r_init_state

        T = x.shape[0]
        unroll = bool(T <= 32)

        for layer, p in enumerate(self.layers):
            # per-direction initial states for the fused (quote|response) batch
            h0 = jnp.stack([jnp.concatenate([q_h0[2 * layer + d],
                                             r_h0[2 * layer + d]], axis=0)
                            for d in range(2)])               # [2, 2B, H]
            c0 = jnp.stack([jnp.concatenate([q_c0[2 * layer + d],
                                             r_c0[2 * layer + d]], axis=0)
                            for d in range(2)])

            # Hoisted input projection for every timestep / both directions:
            # one large time-parallel bf16 MXU matmul, f32 accumulation.
            gx = jnp.einsum("tbe,deg->dtbg", x.astype(jnp.bfloat16), p["wih_t"],
                            preferred_element_type=jnp.float32)
            gx = gx + p["bias"][:, None, None, :]             # [2, T, 2B, 4H]

            out = lstm_layer_fused(gx, p["whh_t"], h0, c0, unroll=unroll)
            # out: [2, T, 2B, H]  (dir 1 already in natural time order)
            x = jnp.concatenate([out[0], out[1]], axis=-1)    # [T, 2B, 2H]
            # (inter-layer lstm_drop_prob dropout is identity in eval mode)

        q_out = jnp.transpose(x[:, :B], (1, 0, 2))            # [B, T, 2H]
        r_out = jnp.transpose(x[:, B:], (1, 0, 2))
        return q_out, r_out


# ----------------------------------------------------------------------------
# Pure-JAX reference (no Pallas) for a numerical sanity check.
# Mirrors the bf16 operand rounding of the kernel path (f32 accumulation).
# ----------------------------------------------------------------------------
def _ref_lstm_direction(x_f32, wih_f32, whh_f32, bias, h0, c0, reverse):
    T = x_f32.shape[0]
    H = h0.shape[-1]
    h, c = h0, c0
    outs = [None] * T
    order = range(T - 1, -1, -1) if reverse else range(T)
    for t in order:
        hq = h.astype(jnp.bfloat16).astype(jnp.float32)
        gates = x_f32[t] @ wih_f32 + bias + hq @ whh_f32
        i_g = jax.nn.sigmoid(gates[:, 0 * H:1 * H])
        f_g = jax.nn.sigmoid(gates[:, 1 * H:2 * H])
        g_g = jnp.tanh(gates[:, 2 * H:3 * H])
        o_g = jax.nn.sigmoid(gates[:, 3 * H:4 * H])
        c = f_g * c + i_g * g_g
        h = o_g * jnp.tanh(c)
        outs[t] = h
    return jnp.stack(outs, axis=0)


def _ref_bilstm(model, x_btE, h0_all, c0_all):
    x = jnp.transpose(x_btE, (1, 0, 2))                        # [T, B, E]
    for layer, p in enumerate(model.layers):
        xin = x.astype(jnp.bfloat16).astype(jnp.float32)
        outs = []
        for d in range(2):
            outs.append(_ref_lstm_direction(
                xin,
                p["wih_t"][d].astype(jnp.float32),
                p["whh_t"][d].astype(jnp.float32),
                p["bias"][d],
                h0_all[2 * layer + d], c0_all[2 * layer + d],
                reverse=(d == 1)))
        x = jnp.concatenate(outs, axis=-1)                     # [T, B, 2H]
    return jnp.transpose(x, (1, 0, 2))                         # [B, T, 2H]


# ----------------------------------------------------------------------------
if __name__ == "__main__":
    B, T = 2, 8
    n_words = 49                      # vocabulary_size = len(word2id) + 1 = 50
    config = {
        "word2id": {f"w{i}": i + 1 for i in range(n_words)},
        "pretrain_emb": False,
        "embedding_size": 32,
        "hidden_size": 32,
        "layer_num": 2,
        "drop_prob": 0.1,
        "lstm_drop_prob": 0.1,
    }

    key = jax.random.PRNGKey(0)
    k_model, k_q, k_r, k_h = jax.random.split(key, 4)
    model = TextBiLSTMPallas(config, k_model)

    H, L = config["hidden_size"], config["layer_num"]
    X_q = jax.random.randint(k_q, (B, T), 0, model.vocabulary_size, jnp.int32)
    X_r = jax.random.randint(k_r, (B, T), 0, model.vocabulary_size, jnp.int32)

    kh1, kh2, kh3, kh4 = jax.random.split(k_h, 4)
    q_init = (0.1 * jax.random.normal(kh1, (2 * L, B, H), jnp.float32),
              0.1 * jax.random.normal(kh2, (2 * L, B, H), jnp.float32))
    r_init = (0.1 * jax.random.normal(kh3, (2 * L, B, H), jnp.float32),
              0.1 * jax.random.normal(kh4, (2 * L, B, H), jnp.float32))

    forward = jax.jit(model.__call__)
    quote_out, resp_out = forward(X_q, X_r, q_init, r_init)
    jax.block_until_ready((quote_out, resp_out))

    assert quote_out.shape == (B, T, 2 * H), quote_out.shape
    assert resp_out.shape == (B, T, 2 * H), resp_out.shape

    # Numerical check against the pure-JAX reference.
    q_emb = jnp.take(model.embedding, X_q, axis=0)
    r_emb = jnp.take(model.embedding, X_r, axis=0)
    ref_q = _ref_bilstm(model, q_emb, q_init[0], q_init[1])
    ref_r = _ref_bilstm(model, r_emb, r_init[0], r_init[1])
    np.testing.assert_allclose(np.asarray(quote_out), np.asarray(ref_q),
                               rtol=2e-3, atol=2e-3)
    np.testing.assert_allclose(np.asarray(resp_out), np.asarray(ref_r),
                               rtol=2e-3, atol=2e-3)

    print("KERNEL_OK")
</pallas_src>

<mosaic_0001>
module attributes {stable_mosaic.version = 11 : i64} {
  func.func @_lstm_recurrence_kernel(%arg0: i32, %arg1: memref<1x8x4x128xf32, #tpu.memory_space<vmem>>, %arg2: memref<1x32x128xbf16, #tpu.memory_space<vmem>>, %arg3: memref<1x4x32xf32, #tpu.memory_space<vmem>>, %arg4: memref<1x4x32xf32, #tpu.memory_space<vmem>>, %arg5: memref<1x8x4x32xf32, #tpu.memory_space<vmem>>) attributes {dimension_semantics = [#tpu.dimension_semantics<parallel>], iteration_bounds = array<i64: 2>, scalar_prefetch = 0 : i64, scratch_operands = 0 : i64, tpu.core_type = #tpu.core_type<tc>, window_params = [{transform_indices = @transform_0, window_bounds = array<i64: 1, 8, 4, 128>}, {transform_indices = @transform_1, window_bounds = array<i64: 1, 32, 128>}, {transform_indices = @transform_2, window_bounds = array<i64: 1, 4, 32>}, {transform_indices = @transform_3, window_bounds = array<i64: 1, 4, 32>}, {transform_indices = @transform_4, window_bounds = array<i64: 1, 8, 4, 32>}]} {
    %c1_i32 = arith.constant 1 : i32
    %0 = arith.cmpi eq, %arg0, %c1_i32 : i32
    %c0 = arith.constant 0 : index
    %c0_0 = arith.constant 0 : index
    %c0_1 = arith.constant 0 : index
    %1 = vector.load %arg2[%c0, %c0_0, %c0_1] : memref<1x32x128xbf16, #tpu.memory_space<vmem>>, vector<1x32x128xbf16>
    %2 = vector.shape_cast %1 : vector<1x32x128xbf16> to vector<32x128xbf16>
    %c0_2 = arith.constant 0 : index
    %c0_3 = arith.constant 0 : index
    %c0_4 = arith.constant 0 : index
    %3 = vector.load %arg3[%c0_2, %c0_3, %c0_4] : memref<1x4x32xf32, #tpu.memory_space<vmem>>, vector<1x4x32xf32>
    %4 = vector.shape_cast %3 : vector<1x4x32xf32> to vector<4x32xf32>
    %c0_5 = arith.constant 0 : index
    %c0_6 = arith.constant 0 : index
    %c0_7 = arith.constant 0 : index
    %5 = vector.load %arg4[%c0_5, %c0_6, %c0_7] : memref<1x4x32xf32, #tpu.memory_space<vmem>>, vector<1x4x32xf32>
    %6 = vector.shape_cast %5 : vector<1x4x32xf32> to vector<4x32xf32>
    %c0_i32 = arith.constant 0 : i32
    %c7_i32 = arith.constant 7 : i32
    %7 = arith.subi %c7_i32, %c0_i32 : i32
    %8 = arith.select %0, %7, %c0_i32 : i32
    %c0_8 = arith.constant 0 : index
    %9 = arith.index_cast %8 : i32 to index
    %c0_9 = arith.constant 0 : index
    %c0_10 = arith.constant 0 : index
    %10 = vector.load %arg1[%c0_8, %9, %c0_9, %c0_10] : memref<1x8x4x128xf32, #tpu.memory_space<vmem>>, vector<1x1x4x128xf32>
    %11 = vector.shape_cast %10 : vector<1x1x4x128xf32> to vector<4x128xf32>
    %12 = arith.truncf %4 : vector<4x32xf32> to vector<4x32xbf16>
    %cst = arith.constant dense<0.000000e+00> : vector<4x128xf32>
    %13 = tpu.matmul %12, %2, %cst {dimension_numbers = #tpu.dot_dimension_numbers<[1], [0], [0], [1], [0, 0, 1, 1], [], []>} : vector<4x32xbf16>, vector<32x128xbf16>, vector<4x128xf32> -> vector<4x128xf32>
    %14 = arith.addf %11, %13 : vector<4x128xf32>
    %15 = vector.extract_strided_slice %14 {offsets = [0, 0], sizes = [4, 32], strides = [1, 1]} : vector<4x128xf32> to vector<4x32xf32>
    %16 = arith.negf %15 : vector<4x32xf32>
    %17 = math.exp %16 : vector<4x32xf32>
    %cst_11 = arith.constant 1.000000e+00 : f32
    %18 = vector.broadcast %cst_11 : f32 to vector<4x32xf32>
    %19 = arith.addf %18, %17 : vector<4x32xf32>
    %20 = arith.divf %18, %19 : vector<4x32xf32>
    %21 = vector.extract_strided_slice %14 {offsets = [0, 32], sizes = [4, 32], strides = [1, 1]} : vector<4x128xf32> to vector<4x32xf32>
    %22 = arith.negf %21 : vector<4x32xf32>
    %23 = math.exp %22 : vector<4x32xf32>
    %cst_12 = arith.constant 1.000000e+00 : f32
    %24 = vector.broadcast %cst_12 : f32 to vector<4x32xf32>
    %25 = arith.addf %24, %23 : vector<4x32xf32>
    %26 = arith.divf %24, %25 : vector<4x32xf32>
    %27 = vector.extract_strided_slice %14 {offsets = [0, 64], sizes = [4, 32], strides = [1, 1]} : vector<4x128xf32> to vector<4x32xf32>
    %28 = math.tanh %27 : vector<4x32xf32>
    %29 = vector.extract_strided_slice %14 {offsets = [0, 96], sizes = [4, 32], strides = [1, 1]} : vector<4x128xf32> to vector<4x32xf32>
    %30 = arith.negf %29 : vector<4x32xf32>
    %31 = math.exp %30 : vector<4x32xf32>
    %cst_13 = arith.constant 1.000000e+00 : f32
    %32 = vector.broadcast %cst_13 : f32 to vector<4x32xf32>
    %33 = arith.addf %32, %31 : vector<4x32xf32>
    %34 = arith.divf %32, %33 : vector<4x32xf32>
    %35 = arith.mulf %26, %6 : vector<4x32xf32>
    %36 = arith.mulf %20, %28 : vector<4x32xf32>
    %37 = arith.addf %35, %36 : vector<4x32xf32>
    %38 = math.tanh %37 : vector<4x32xf32>
    %39 = arith.mulf %34, %38 : vector<4x32xf32>
    %c0_14 = arith.constant 0 : index
    %40 = arith.index_cast %8 : i32 to index
    %c0_15 = arith.constant 0 : index
    %c0_16 = arith.constant 0 : index
    %41 = vector.load %arg5[%c0_14, %40, %c0_15, %c0_16] : memref<1x8x4x32xf32, #tpu.memory_space<vmem>>, vector<1x1x4x32xf32>
    %42 = vector.shape_cast %41 : vector<1x1x4x32xf32> to vector<4x32xf32>
    %43 = vector.shape_cast %39 : vector<4x32xf32> to vector<1x1x4x32xf32>
    tpu.vector_store %arg5[%c0_14, %40, %c0_15, %c0_16], %43 {strides = array<i32>} : memref<1x8x4x32xf32, #tpu.memory_space<vmem>>, vector<1x1x4x32xf32>,
    %c1_i32_17 = arith.constant 1 : i32
    %c7_i32_18 = arith.constant 7 : i32
    %44 = arith.subi %c7_i32_18, %c1_i32_17 : i32
    %45 = arith.select %0, %44, %c1_i32_17 : i32
    %c0_19 = arith.constant 0 : index
    %46 = arith.index_cast %45 : i32 to index
    %c0_20 = arith.constant 0 : index
    %c0_21 = arith.constant 0 : index
    %47 = vector.load %arg1[%c0_19, %46, %c0_20, %c0_21] : memref<1x8x4x128xf32, #tpu.memory_space<vmem>>, vector<1x1x4x128xf32>
    %48 = vector.shape_cast %47 : vector<1x1x4x128xf32> to vector<4x128xf32>
    %49 = arith.truncf %39 : vector<4x32xf32> to vector<4x32xbf16>
    %cst_22 = arith.constant dense<0.000000e+00> : vector<4x128xf32>
    %50 = tpu.matmul %49, %2, %cst_22 {dimension_numbers = #tpu.dot_dimension_numbers<[1], [0], [0], [1], [0, 0, 1, 1], [], []>} : vector<4x32xbf16>, vector<32x128xbf16>, vector<4x128xf32> -> vector<4x128xf32>
    %51 = arith.addf %48, %50 : vector<4x128xf32>
    %52 = vector.extract_strided_slice %51 {offsets = [0, 0], sizes = [4, 32], strides = [1, 1]} : vector<4x128xf32> to vector<4x32xf32>
    %53 = arith.negf %52 : vector<4x32xf32>
    %54 = math.exp %53 : vector<4x32xf32>
    %cst_23 = arith.constant 1.000000e+00 : f32
    %55 = vector.broadcast %cst_23 : f32 to vector<4x32xf32>
    %56 = arith.addf %55, %54 : vector<4x32xf32>
    %57 = arith.divf %55, %56 : vector<4x32xf32>
    %58 = vector.extract_strided_slice %51 {offsets = [0, 32], sizes = [4, 32], strides = [1, 1]} : vector<4x128xf32> to vector<4x32xf32>
    %59 = arith.negf %58 : vector<4x32xf32>
    %60 = math.exp %59 : vector<4x32xf32>
    %cst_24 = arith.constant 1.000000e+00 : f32
    %61 = vector.broadcast %cst_24 : f32 to vector<4x32xf32>
    %62 = arith.addf %61, %60 : vector<4x32xf32>
    %63 = arith.divf %61, %62 : vector<4x32xf32>
    %64 = vector.extract_strided_slice %51 {offsets = [0, 64], sizes = [4, 32], strides = [1, 1]} : vector<4x128xf32> to vector<4x32xf32>
    %65 = math.tanh %64 : vector<4x32xf32>
    %66 = vector.extract_strided_slice %51 {offsets = [0, 96], sizes = [4, 32], strides = [1, 1]} : vector<4x128xf32> to vector<4x32xf32>
    %67 = arith.negf %66 : vector<4x32xf32>
    %68 = math.exp %67 : vector<4x32xf32>
    %cst_25 = arith.constant 1.000000e+00 : f32
    %69 = vector.broadcast %cst_25 : f32 to vector<4x32xf32>
    %70 = arith.addf %69, %68 : vector<4x32xf32>
    %71 = arith.divf %69, %70 : vector<4x32xf32>
    %72 = arith.mulf %63, %37 : vector<4x32xf32>
    %73 = arith.mulf %57, %65 : vector<4x32xf32>
    %74 = arith.addf %72, %73 : vector<4x32xf32>
    %75 = math.tanh %74 : vector<4x32xf32>
    %76 = arith.mulf %71, %75 : vector<4x32xf32>
    %c0_26 = arith.constant 0 : index
    %77 = arith.index_cast %45 : i32 to index
    %c0_27 = arith.constant 0 : index
    %c0_28 = arith.constant 0 : index
    %78 = vector.load %arg5[%c0_26, %77, %c0_27, %c0_28] : memref<1x8x4x32xf32, #tpu.memory_space<vmem>>, vector<1x1x4x32xf32>
    %79 = vector.shape_cast %78 : vector<1x1x4x32xf32> to vector<4x32xf32>
    %80 = vector.shape_cast %76 : vector<4x32xf32> to vector<1x1x4x32xf32>
    tpu.vector_store %arg5[%c0_26, %77, %c0_27, %c0_28], %80 {strides = array<i32>} : memref<1x8x4x32xf32, #tpu.memory_space<vmem>>, vector<1x1x4x32xf32>,
    %c2_i32 = arith.constant 2 : i32
    %c7_i32_29 = arith.constant 7 : i32
    %81 = arith.subi %c7_i32_29, %c2_i32 : i32
    %82 = arith.select %0, %81, %c2_i32 : i32
    %c0_30 = arith.constant 0 : index
    %83 = arith.index_cast %82 : i32 to index
    %c0_31 = arith.constant 0 : index
    %c0_32 = arith.constant 0 : index
    %84 = vector.load %arg1[%c0_30, %83, %c0_31, %c0_32] : memref<1x8x4x128xf32, #tpu.memory_space<vmem>>, vector<1x1x4x128xf32>
    %85 = vector.shape_cast %84 : vector<1x1x4x128xf32> to vector<4x128xf32>
    %86 = arith.truncf %76 : vector<4x32xf32> to vector<4x32xbf16>
    %cst_33 = arith.constant dense<0.000000e+00> : vector<4x128xf32>
    %87 = tpu.matmul %86, %2, %cst_33 {dimension_numbers = #tpu.dot_dimension_numbers<[1], [0], [0], [1], [0, 0, 1, 1], [], []>} : vector<4x32xbf16>, vector<32x128xbf16>, vector<4x128xf32> -> vector<4x128xf32>
    %88 = arith.addf %85, %87 : vector<4x128xf32>
    %89 = vector.extract_strided_slice %88 {offsets = [0, 0], sizes = [4, 32], strides = [1, 1]} : vector<4x128xf32> to vector<4x32xf32>
    %90 = arith.negf %89 : vector<4x32xf32>
    %91 = math.exp %90 : vector<4x32xf32>
    %cst_34 = arith.constant 1.000000e+00 : f32
    %92 = vector.broadcast %cst_34 : f32 to vector<4x32xf32>
    %93 = arith.addf %92, %91 : vector<4x32xf32>
    %94 = arith.divf %92, %93 : vector<4x32xf32>
    %95 = vector.extract_strided_slice %88 {offsets = [0, 32], sizes = [4, 32], strides = [1, 1]} : vector<4x128xf32> to vector<4x32xf32>
    %96 = arith.negf %95 : vector<4x32xf32>
    %97 = math.exp %96 : vector<4x32xf32>
    %cst_35 = arith.constant 1.000000e+00 : f32
    %98 = vector.broadcast %cst_35 : f32 to vector<4x32xf32>
    %99 = arith.addf %98, %97 : vector<4x32xf32>
    %100 = arith.divf %98, %99 : vector<4x32xf32>
    %101 = vector.extract_strided_slice %88 {offsets = [0, 64], sizes = [4, 32], strides = [1, 1]} : vector<4x128xf32> to vector<4x32xf32>
    %102 = math.tanh %101 : vector<4x32xf32>
    %103 = vector.extract_strided_slice %88 {offsets = [0, 96], sizes = [4, 32], strides = [1, 1]} : vector<4x128xf32> to vector<4x32xf32>
    %104 = arith.negf %103 : vector<4x32xf32>
    %105 = math.exp %104 : vector<4x32xf32>
    %cst_36 = arith.constant 1.000000e+00 : f32
    %106 = vector.broadcast %cst_36 : f32 to vector<4x32xf32>
    %107 = arith.addf %106, %105 : vector<4x32xf32>
    %108 = arith.divf %106, %107 : vector<4x32xf32>
    %109 = arith.mulf %100, %74 : vector<4x32xf32>
    %110 = arith.mulf %94, %102 : vector<4x32xf32>
    %111 = arith.addf %109, %110 : vector<4x32xf32>
    %112 = math.tanh %111 : vector<4x32xf32>
    %113 = arith.mulf %108, %112 : vector<4x32xf32>
    %c0_37 = arith.constant 0 : index
    %114 = arith.index_cast %82 : i32 to index
    %c0_38 = arith.constant 0 : index
    %c0_39 = arith.constant 0 : index
    %115 = vector.load %arg5[%c0_37, %114, %c0_38, %c0_39] : memref<1x8x4x32xf32, #tpu.memory_space<vmem>>, vector<1x1x4x32xf32>
    %116 = vector.shape_cast %115 : vector<1x1x4x32xf32> to vector<4x32xf32>
    %117 = vector.shape_cast %113 : vector<4x32xf32> to vector<1x1x4x32xf32>
    tpu.vector_store %arg5[%c0_37, %114, %c0_38, %c0_39], %117 {strides = array<i32>} : memref<1x8x4x32xf32, #tpu.memory_space<vmem>>, vector<1x1x4x32xf32>,
    %c3_i32 = arith.constant 3 : i32
    %c7_i32_40 = arith.constant 7 : i32
    %118 = arith.subi %c7_i32_40, %c3_i32 : i32
    %119 = arith.select %0, %118, %c3_i32 : i32
    %c0_41 = arith.constant 0 : index
    %120 = arith.index_cast %119 : i32 to index
    %c0_42 = arith.constant 0 : index
    %c0_43 = arith.constant 0 : index
    %121 = vector.load %arg1[%c0_41, %120, %c0_42, %c0_43] : memref<1x8x4x128xf32, #tpu.memory_space<vmem>>, vector<1x1x4x128xf32>
    %122 = vector.shape_cast %121 : vector<1x1x4x128xf32> to vector<4x128xf32>
    %123 = arith.truncf %113 : vector<4x32xf32> to vector<4x32xbf16>
    %cst_44 = arith.constant dense<0.000000e+00> : vector<4x128xf32>
    %124 = tpu.matmul %123, %2, %cst_44 {dimension_numbers = #tpu.dot_dimension_numbers<[1], [0], [0], [1], [0, 0, 1, 1], [], []>} : vector<4x32xbf16>, vector<32x128xbf16>, vector<4x128xf32> -> vector<4x128xf32>
    %125 = arith.addf %122, %124 : vector<4x128xf32>
    %126 = vector.extract_strided_slice %125 {offsets = [0, 0], sizes = [4, 32], strides = [1, 1]} : vector<4x128xf32> to vector<4x32xf32>
    %127 = arith.negf %126 : vector<4x32xf32>
    %128 = math.exp %127 : vector<4x32xf32>
    %cst_45 = arith.constant 1.000000e+00 : f32
    %129 = vector.broadcast %cst_45 : f32 to vector<4x32xf32>
    %130 = arith.addf %129, %128 : vector<4x32xf32>
    %131 = arith.divf %129, %130 : vector<4x32xf32>
    %132 = vector.extract_strided_slice %125 {offsets = [0, 32], sizes = [4, 32], strides = [1, 1]} : vector<4x128xf32> to vector<4x32xf32>
    %133 = arith.negf %132 : vector<4x32xf32>
    %134 = math.exp %133 : vector<4x32xf32>
    %cst_46 = arith.constant 1.000000e+00 : f32
    %135 = vector.broadcast %cst_46 : f32 to vector<4x32xf32>
    %136 = arith.addf %135, %134 : vector<4x32xf32>
    %137 = arith.divf %135, %136 : vector<4x32xf32>
    %138 = vector.extract_strided_slice %125 {offsets = [0, 64], sizes = [4, 32], strides = [1, 1]} : vector<4x128xf32> to vector<4x32xf32>
    %139 = math.tanh %138 : vector<4x32xf32>
    %140 = vector.extract_strided_slice %125 {offsets = [0, 96], sizes = [4, 32], strides = [1, 1]} : vector<4x128xf32> to vector<4x32xf32>
    %141 = arith.negf %140 : vector<4x32xf32>
    %142 = math.exp %141 : vector<4x32xf32>
    %cst_47 = arith.constant 1.000000e+00 : f32
    %143 = vector.broadcast %cst_47 : f32 to vector<4x32xf32>
    %144 = arith.addf %143, %142 : vector<4x32xf32>
    %145 = arith.divf %143, %144 : vector<4x32xf32>
    %146 = arith.mulf %137, %111 : vector<4x32xf32>
    %147 = arith.mulf %131, %139 : vector<4x32xf32>
    %148 = arith.addf %146, %147 : vector<4x32xf32>
    %149 = math.tanh %148 : vector<4x32xf32>
    %150 = arith.mulf %145, %149 : vector<4x32xf32>
    %c0_48 = arith.constant 0 : index
    %151 = arith.index_cast %119 : i32 to index
    %c0_49 = arith.constant 0 : index
    %c0_50 = arith.constant 0 : index
    %152 = vector.load %arg5[%c0_48, %151, %c0_49, %c0_50] : memref<1x8x4x32xf32, #tpu.memory_space<vmem>>, vector<1x1x4x32xf32>
    %153 = vector.shape_cast %152 : vector<1x1x4x32xf32> to vector<4x32xf32>
    %154 = vector.shape_cast %150 : vector<4x32xf32> to vector<1x1x4x32xf32>
    tpu.vector_store %arg5[%c0_48, %151, %c0_49, %c0_50], %154 {strides = array<i32>} : memref<1x8x4x32xf32, #tpu.memory_space<vmem>>, vector<1x1x4x32xf32>,
    %c4_i32 = arith.constant 4 : i32
    %c7_i32_51 = arith.constant 7 : i32
    %155 = arith.subi %c7_i32_51, %c4_i32 : i32
    %156 = arith.select %0, %155, %c4_i32 : i32
    %c0_52 = arith.constant 0 : index
    %157 = arith.index_cast %156 : i32 to index
    %c0_53 = arith.constant 0 : index
    %c0_54 = arith.constant 0 : index
    %158 = vector.load %arg1[%c0_52, %157, %c0_53, %c0_54] : memref<1x8x4x128xf32, #tpu.memory_space<vmem>>, vector<1x1x4x128xf32>
    %159 = vector.shape_cast %158 : vector<1x1x4x128xf32> to vector<4x128xf32>
    %160 = arith.truncf %150 : vector<4x32xf32> to vector<4x32xbf16>
    %cst_55 = arith.constant dense<0.000000e+00> : vector<4x128xf32>
    %161 = tpu.matmul %160, %2, %cst_55 {dimension_numbers = #tpu.dot_dimension_numbers<[1], [0], [0], [1], [0, 0, 1, 1], [], []>} : vector<4x32xbf16>, vector<32x128xbf16>, vector<4x128xf32> -> vector<4x128xf32>
    %162 = arith.addf %159, %161 : vector<4x128xf32>
    %163 = vector.extract_strided_slice %162 {offsets = [0, 0], sizes = [4, 32], strides = [1, 1]} : vector<4x128xf32> to vector<4x32xf32>
    %164 = arith.negf %163 : vector<4x32xf32>
    %165 = math.exp %164 : vector<4x32xf32>
    %cst_56 = arith.constant 1.000000e+00 : f32
    %166 = vector.broadcast %cst_56 : f32 to vector<4x32xf32>
    %167 = arith.addf %166, %165 : vector<4x32xf32>
    %168 = arith.divf %166, %167 : vector<4x32xf32>
    %169 = vector.extract_strided_slice %162 {offsets = [0, 32], sizes = [4, 32], strides = [1, 1]} : vector<4x128xf32> to vector<4x32xf32>
    %170 = arith.negf %169 : vector<4x32xf32>
    %171 = math.exp %170 : vector<4x32xf32>
    %cst_57 = arith.constant 1.000000e+00 : f32
    %172 = vector.broadcast %cst_57 : f32 to vector<4x32xf32>
    %173 = arith.addf %172, %171 : vector<4x32xf32>
    %174 = arith.divf %172, %173 : vector<4x32xf32>
    %175 = vector.extract_strided_slice %162 {offsets = [0, 64], sizes = [4, 32], strides = [1, 1]} : vector<4x128xf32> to vector<4x32xf32>
    %176 = math.tanh %175 : vector<4x32xf32>
    %177 = vector.extract_strided_slice %162 {offsets = [0, 96], sizes = [4, 32], strides = [1, 1]} : vector<4x128xf32> to vector<4x32xf32>
    %178 = arith.negf %177 : vector<4x32xf32>
    %179 = math.exp %178 : vector<4x32xf32>
    %cst_58 = arith.constant 1.000000e+00 : f32
    %180 = vector.broadcast %cst_58 : f32 to vector<4x32xf32>
    %181 = arith.addf %180, %179 : vector<4x32xf32>
    %182 = arith.divf %180, %181 : vector<4x32xf32>
    %183 = arith.mulf %174, %148 : vector<4x32xf32>
    %184 = arith.mulf %168, %176 : vector<4x32xf32>
    %185 = arith.addf %183, %184 : vector<4x32xf32>
    %186 = math.tanh %185 : vector<4x32xf32>
    %187 = arith.mulf %182, %186 : vector<4x32xf32>
    %c0_59 = arith.constant 0 : index
    %188 = arith.index_cast %156 : i32 to index
    %c0_60 = arith.constant 0 : index
    %c0_61 = arith.constant 0 : index
    %189 = vector.load %arg5[%c0_59, %188, %c0_60, %c0_61] : memref<1x8x4x32xf32, #tpu.memory_space<vmem>>, vector<1x1x4x32xf32>
    %190 = vector.shape_cast %189 : vector<1x1x4x32xf32> to vector<4x32xf32>
    %191 = vector.shape_cast %187 : vector<4x32xf32> to vector<1x1x4x32xf32>
    tpu.vector_store %arg5[%c0_59, %188, %c0_60, %c0_61], %191 {strides = array<i32>} : memref<1x8x4x32xf32, #tpu.memory_space<vmem>>, vector<1x1x4x32xf32>,
    %c5_i32 = arith.constant 5 : i32
    %c7_i32_62 = arith.constant 7 : i32
    %192 = arith.subi %c7_i32_62, %c5_i32 : i32
    %193 = arith.select %0, %192, %c5_i32 : i32
    %c0_63 = arith.constant 0 : index
    %194 = arith.index_cast %193 : i32 to index
    %c0_64 = arith.constant 0 : index
    %c0_65 = arith.constant 0 : index
    %195 = vector.load %arg1[%c0_63, %194, %c0_64, %c0_65] : memref<1x8x4x128xf32, #tpu.memory_space<vmem>>, vector<1x1x4x128xf32>
    %196 = vector.shape_cast %195 : vector<1x1x4x128xf32> to vector<4x128xf32>
    %197 = arith.truncf %187 : vector<4x32xf32> to vector<4x32xbf16>
    %cst_66 = arith.constant dense<0.000000e+00> : vector<4x128xf32>
    %198 = tpu.matmul %197, %2, %cst_66 {dimension_numbers = #tpu.dot_dimension_numbers<[1], [0], [0], [1], [0, 0, 1, 1], [], []>} : vector<4x32xbf16>, vector<32x128xbf16>, vector<4x128xf32> -> vector<4x128xf32>
    %199 = arith.addf %196, %198 : vector<4x128xf32>
    %200 = vector.extract_strided_slice %199 {offsets = [0, 0], sizes = [4, 32], strides = [1, 1]} : vector<4x128xf32> to vector<4x32xf32>
    %201 = arith.negf %200 : vector<4x32xf32>
    %202 = math.exp %201 : vector<4x32xf32>
    %cst_67 = arith.constant 1.000000e+00 : f32
    %203 = vector.broadcast %cst_67 : f32 to vector<4x32xf32>
    %204 = arith.addf %203, %202 : vector<4x32xf32>
    %205 = arith.divf %203, %204 : vector<4x32xf32>
    %206 = vector.extract_strided_slice %199 {offsets = [0, 32], sizes = [4, 32], strides = [1, 1]} : vector<4x128xf32> to vector<4x32xf32>
    %207 = arith.negf %206 : vector<4x32xf32>
    %208 = math.exp %207 : vector<4x32xf32>
    %cst_68 = arith.constant 1.000000e+00 : f32
    %209 = vector.broadcast %cst_68 : f32 to vector<4x32xf32>
    %210 = arith.addf %209, %208 : vector<4x32xf32>
    %211 = arith.divf %209, %210 : vector<4x32xf32>
    %212 = vector.extract_strided_slice %199 {offsets = [0, 64], sizes = [4, 32], strides = [1, 1]} : vector<4x128xf32> to vector<4x32xf32>
    %213 = math.tanh %212 : vector<4x32xf32>
    %214 = vector.extract_strided_slice %199 {offsets = [0, 96], sizes = [4, 32], strides = [1, 1]} : vector<4x128xf32> to vector<4x32xf32>
    %215 = arith.negf %214 : vector<4x32xf32>
    %216 = math.exp %215 : vector<4x32xf32>
    %cst_69 = arith.constant 1.000000e+00 : f32
    %217 = vector.broadcast %cst_69 : f32 to vector<4x32xf32>
    %218 = arith.addf %217, %216 : vector<4x32xf32>
    %219 = arith.divf %217, %218 : vector<4x32xf32>
    %220 = arith.mulf %211, %185 : vector<4x32xf32>
    %221 = arith.mulf %205, %213 : vector<4x32xf32>
    %222 = arith.addf %220, %221 : vector<4x32xf32>
    %223 = math.tanh %222 : vector<4x32xf32>
    %224 = arith.mulf %219, %223 : vector<4x32xf32>
    %c0_70 = arith.constant 0 : index
    %225 = arith.index_cast %193 : i32 to index
    %c0_71 = arith.constant 0 : index
    %c0_72 = arith.constant 0 : index
    %226 = vector.load %arg5[%c0_70, %225, %c0_71, %c0_72] : memref<1x8x4x32xf32, #tpu.memory_space<vmem>>, vector<1x1x4x32xf32>
    %227 = vector.shape_cast %226 : vector<1x1x4x32xf32> to vector<4x32xf32>
    %228 = vector.shape_cast %224 : vector<4x32xf32> to vector<1x1x4x32xf32>
    tpu.vector_store %arg5[%c0_70, %225, %c0_71, %c0_72], %228 {strides = array<i32>} : memref<1x8x4x32xf32, #tpu.memory_space<vmem>>, vector<1x1x4x32xf32>,
    %c6_i32 = arith.constant 6 : i32
    %c7_i32_73 = arith.constant 7 : i32
    %229 = arith.subi %c7_i32_73, %c6_i32 : i32
    %230 = arith.select %0, %229, %c6_i32 : i32
    %c0_74 = arith.constant 0 : index
    %231 = arith.index_cast %230 : i32 to index
    %c0_75 = arith.constant 0 : index
    %c0_76 = arith.constant 0 : index
    %232 = vector.load %arg1[%c0_74, %231, %c0_75, %c0_76] : memref<1x8x4x128xf32, #tpu.memory_space<vmem>>, vector<1x1x4x128xf32>
    %233 = vector.shape_cast %232 : vector<1x1x4x128xf32> to vector<4x128xf32>
    %234 = arith.truncf %224 : vector<4x32xf32> to vector<4x32xbf16>
    %cst_77 = arith.constant dense<0.000000e+00> : vector<4x128xf32>
    %235 = tpu.matmul %234, %2, %cst_77 {dimension_numbers = #tpu.dot_dimension_numbers<[1], [0], [0], [1], [0, 0, 1, 1], [], []>} : vector<4x32xbf16>, vector<32x128xbf16>, vector<4x128xf32> -> vector<4x128xf32>
    %236 = arith.addf %233, %235 : vector<4x128xf32>
    %237 = vector.extract_strided_slice %236 {offsets = [0, 0], sizes = [4, 32], strides = [1, 1]} : vector<4x128xf32> to vector<4x32xf32>
    %238 = arith.negf %237 : vector<4x32xf32>
    %239 = math.exp %238 : vector<4x32xf32>
    %cst_78 = arith.constant 1.000000e+00 : f32
    %240 = vector.broadcast %cst_78 : f32 to vector<4x32xf32>
    %241 = arith.addf %240, %239 : vector<4x32xf32>
    %242 = arith.divf %240, %241 : vector<4x32xf32>
    %243 = vector.extract_strided_slice %236 {offsets = [0, 32], sizes = [4, 32], strides = [1, 1]} : vector<4x128xf32> to vector<4x32xf32>
    %244 = arith.negf %243 : vector<4x32xf32>
    %245 = math.exp %244 : vector<4x32xf32>
    %cst_79 = arith.constant 1.000000e+00 : f32
    %246 = vector.broadcast %cst_79 : f32 to vector<4x32xf32>
    %247 = arith.addf %246, %245 : vector<4x32xf32>
    %248 = arith.divf %246, %247 : vector<4x32xf32>
    %249 = vector.extract_strided_slice %236 {offsets = [0, 64], sizes = [4, 32], strides = [1, 1]} : vector<4x128xf32> to vector<4x32xf32>
    %250 = math.tanh %249 : vector<4x32xf32>
    %251 = vector.extract_strided_slice %236 {offsets = [0, 96], sizes = [4, 32], strides = [1, 1]} : vector<4x128xf32> to vector<4x32xf32>
    %252 = arith.negf %251 : vector<4x32xf32>
    %253 = math.exp %252 : vector<4x32xf32>
    %cst_80 = arith.constant 1.000000e+00 : f32
    %254 = vector.broadcast %cst_80 : f32 to vector<4x32xf32>
    %255 = arith.addf %254, %253 : vector<4x32xf32>
    %256 = arith.divf %254, %255 : vector<4x32xf32>
    %257 = arith.mulf %248, %222 : vector<4x32xf32>
    %258 = arith.mulf %242, %250 : vector<4x32xf32>
    %259 = arith.addf %257, %258 : vector<4x32xf32>
    %260 = math.tanh %259 : vector<4x32xf32>
    %261 = arith.mulf %256, %260 : vector<4x32xf32>
    %c0_81 = arith.constant 0 : index
    %262 = arith.index_cast %230 : i32 to index
    %c0_82 = arith.constant 0 : index
    %c0_83 = arith.constant 0 : index
    %263 = vector.load %arg5[%c0_81, %262, %c0_82, %c0_83] : memref<1x8x4x32xf32, #tpu.memory_space<vmem>>, vector<1x1x4x32xf32>
    %264 = vector.shape_cast %263 : vector<1x1x4x32xf32> to vector<4x32xf32>
    %265 = vector.shape_cast %261 : vector<4x32xf32> to vector<1x1x4x32xf32>
    tpu.vector_store %arg5[%c0_81, %262, %c0_82, %c0_83], %265 {strides = array<i32>} : memref<1x8x4x32xf32, #tpu.memory_space<vmem>>, vector<1x1x4x32xf32>,
    %c7_i32_84 = arith.constant 7 : i32
    %c7_i32_85 = arith.constant 7 : i32
    %266 = arith.subi %c7_i32_85, %c7_i32_84 : i32
    %267 = arith.select %0, %266, %c7_i32_84 : i32
    %c0_86 = arith.constant 0 : index
    %268 = arith.index_cast %267 : i32 to index
    %c0_87 = arith.constant 0 : index
    %c0_88 = arith.constant 0 : index
    %269 = vector.load %arg1[%c0_86, %268, %c0_87, %c0_88] : memref<1x8x4x128xf32, #tpu.memory_space<vmem>>, vector<1x1x4x128xf32>
    %270 = vector.shape_cast %269 : vector<1x1x4x128xf32> to vector<4x128xf32>
    %271 = arith.truncf %261 : vector<4x32xf32> to vector<4x32xbf16>
    %cst_89 = arith.constant dense<0.000000e+00> : vector<4x128xf32>
    %272 = tpu.matmul %271, %2, %cst_89 {dimension_numbers = #tpu.dot_dimension_numbers<[1], [0], [0], [1], [0, 0, 1, 1], [], []>} : vector<4x32xbf16>, vector<32x128xbf16>, vector<4x128xf32> -> vector<4x128xf32>
    %273 = arith.addf %270, %272 : vector<4x128xf32>
    %274 = vector.extract_strided_slice %273 {offsets = [0, 0], sizes = [4, 32], strides = [1, 1]} : vector<4x128xf32> to vector<4x32xf32>
    %275 = arith.negf %274 : vector<4x32xf32>
    %276 = math.exp %275 : vector<4x32xf32>
    %cst_90 = arith.constant 1.000000e+00 : f32
    %277 = vector.broadcast %cst_90 : f32 to vector<4x32xf32>
    %278 = arith.addf %277, %276 : vector<4x32xf32>
    %279 = arith.divf %277, %278 : vector<4x32xf32>
    %280 = vector.extract_strided_slice %273 {offsets = [0, 32], sizes = [4, 32], strides = [1, 1]} : vector<4x128xf32> to vector<4x32xf32>
    %281 = arith.negf %280 : vector<4x32xf32>
    %282 = math.exp %281 : vector<4x32xf32>
    %cst_91 = arith.constant 1.000000e+00 : f32
    %283 = vector.broadcast %cst_91 : f32 to vector<4x32xf32>
    %284 = arith.addf %283, %282 : vector<4x32xf32>
    %285 = arith.divf %283, %284 : vector<4x32xf32>
    %286 = vector.extract_strided_slice %273 {offsets = [0, 64], sizes = [4, 32], strides = [1, 1]} : vector<4x128xf32> to vector<4x32xf32>
    %287 = math.tanh %286 : vector<4x32xf32>
    %288 = vector.extract_strided_slice %273 {offsets = [0, 96], sizes = [4, 32], strides = [1, 1]} : vector<4x128xf32> to vector<4x32xf32>
    %289 = arith.negf %288 : vector<4x32xf32>
    %290 = math.exp %289 : vector<4x32xf32>
    %cst_92 = arith.constant 1.000000e+00 : f32
    %291 = vector.broadcast %cst_92 : f32 to vector<4x32xf32>
    %292 = arith.addf %291, %290 : vector<4x32xf32>
    %293 = arith.divf %291, %292 : vector<4x32xf32>
    %294 = arith.mulf %285, %259 : vector<4x32xf32>
    %295 = arith.mulf %279, %287 : vector<4x32xf32>
    %296 = arith.addf %294, %295 : vector<4x32xf32>
    %297 = math.tanh %296 : vector<4x32xf32>
    %298 = arith.mulf %293, %297 : vector<4x32xf32>
    %c0_93 = arith.constant 0 : index
    %299 = arith.index_cast %267 : i32 to index
    %c0_94 = arith.constant 0 : index
    %c0_95 = arith.constant 0 : index
    %300 = vector.load %arg5[%c0_93, %299, %c0_94, %c0_95] : memref<1x8x4x32xf32, #tpu.memory_space<vmem>>, vector<1x1x4x32xf32>
    %301 = vector.shape_cast %300 : vector<1x1x4x32xf32> to vector<4x32xf32>
    %302 = vector.shape_cast %298 : vector<4x32xf32> to vector<1x1x4x32xf32>
    tpu.vector_store %arg5[%c0_93, %299, %c0_94, %c0_95], %302 {strides = array<i32>} : memref<1x8x4x32xf32, #tpu.memory_space<vmem>>, vector<1x1x4x32xf32>,
    %c8_i32 = arith.constant 8 : i32
    return
  }
  func.func @transform_0(%arg0: i32) -> (i32, i32, i32, i32) {
    %c0_i32 = arith.constant 0 : i32
    %c0_i32_0 = arith.constant 0 : i32
    %c0_i32_1 = arith.constant 0 : i32
    %c0_i32_2 = arith.constant 0 : i32
    return %arg0, %c0_i32, %c0_i32_0, %c0_i32_1 : i32, i32, i32, i32
  }
  func.func @transform_1(%arg0: i32) -> (i32, i32, i32) {
    %c0_i32 = arith.constant 0 : i32
    %c0_i32_0 = arith.constant 0 : i32
    %c0_i32_1 = arith.constant 0 : i32
    return %arg0, %c0_i32, %c0_i32_0 : i32, i32, i32
  }
  func.func @transform_2(%arg0: i32) -> (i32, i32, i32) {
    %c0_i32 = arith.constant 0 : i32
    %c0_i32_0 = arith.constant 0 : i32
    %c0_i32_1 = arith.constant 0 : i32
    return %arg0, %c0_i32, %c0_i32_0 : i32, i32, i32
  }
  func.func @transform_3(%arg0: i32) -> (i32, i32, i32) {
    %c0_i32 = arith.constant 0 : i32
    %c0_i32_0 = arith.constant 0 : i32
    %c0_i32_1 = arith.constant 0 : i32
    return %arg0, %c0_i32, %c0_i32_0 : i32, i32, i32
  }
  func.func @transform_4(%arg0: i32) -> (i32, i32, i32, i32) {
    %c0_i32 = arith.constant 0 : i32
    %c0_i32_0 = arith.constant 0 : i32
    %c0_i32_1 = arith.constant 0 : i32
    %c0_i32_2 = arith.constant 0 : i32
    return %arg0, %c0_i32, %c0_i32_0, %c0_i32_1 : i32, i32, i32, i32
  }
}

</mosaic_0001>

<bundles_post_ra>
// kernel: a_call__.2
= control target key start
LH: loop header
LB: loop body
LE: loop exit
PB: predicated region body
PF: predicated region fallthrough
CT: control target
= control target key end

     0   :  { %s1301_s15 = smov 0   ;;  %s1575_s0 = inlined_call_operand.vmem [shape: f32[2,8,4,128], index: 0, kind: input, shape index: {}]   ;;  %s1576_s1 = inlined_call_operand.vmem [shape: bf16[2,32,128], index: 1, kind: input, shape index: {}]   ;;  %s1577_s2 = inlined_call_operand.vmem [shape: f32[2,4,32], index: 2, kind: input, shape index: {}]   ;;  %s1578_s3 = inlined_call_operand.vmem [shape: f32[2,4,32], index: 3, kind: input, shape index: {}]   ;;  %s1579_s4 = inlined_call_operand.vmem [shape: f32[2,8,4,32], index: 4, kind: output, shape index: {}]  }
   0x1 LB: > { %s1307_s16 = sadd.s32 4294967295, %s1270_s15   ;;  %p1058_p0 = scmp.ge.s32.totalorder %s1270_s15, 1  ;;  %s1270_s15 = sphi %s1301_s15, %s14_s15  }
   0x2   : > { %p190_p1 = scmp.lt.s32.totalorder %s1270_s15, 3 }
   0x4   : > { %p191_p2 = pnand %p1058_p0, %p190_p1 }
   0x5   : > { %p229_p3 = scmp.lt.s32.totalorder (!%p191_p2), %s1307_s16, 1  ;;  %p253_p4 = scmp.eq.s32.totalorder (!%p191_p2), %s1307_s16, 1 }
   0x6   : > { %194 = sbr.rel (%p191_p2) target bundleno = 5550 (0x15ae), region = 36  ;;  %s1274_s10 = smov (!%p191_p2), 64  }
   0x7   : > { %s1275_s11 = smov (!%p191_p2), 32  }
   0xb   : > { %v1272_v0 = vmov 0.0   ;;  %vm1273_vm0 = vmmov 0   ;;  %s1316_s17 = scalar_select %p229_p3, %s1307_s16, 1  ;;  %vm277_vm1 = vcmask 261120   ;;  %vm355_vm2 = vcmask 257024  }
   0xc   : > { %1122 = vmatprep.subr.bf16.mxu0 %v1272_v0  ;;  %1126 = vmatprep.mubr.msk.bf16.mxu0 %vm1273_vm0, %v1272_v0  ;;  %s1353_s26 = scalar_select %p253_p4, 7, 0 }
   0xd   : > { %1130 = vmatprep.subr.bf16.mxu1 %v1272_v0  ;;  %1134 = vmatprep.mubr.msk.bf16.mxu1 %vm1273_vm0, %v1272_v0  ;;  %s1096_s18 = sshll.u32 %s1316_s17, 4  ;;  %s1063_s19 = sshll.u32 %s1316_s17, 2 }
   0xe   : > { %s238_s22 = scalar_lea.vmem %s1576_s1, %s1096_s18  ;;  %s242_s25 = scalar_lea.vmem %s1577_s2, %s1063_s19 }
   0xf   : > { %v1331_v1 = vld [vmem:[%s238_s22 + $0x8] sm:$0xff]   ;;  %v1334_v2 = vld [vmem:[%s238_s22] sm:$0xff]   ;;  %s1095_s27 = sshll.u32 %s1316_s17, 5  ;;  %s1067_s5 = sshll.u32 %s1353_s26, 2 }
  0x10   : > { %1123 = vmatpush3.bf16.msra.mxu0 %v1331_v1  ;;  %v258_v3 = vld [vmem:[%s242_s25] sm:$0xf]  ;;  %1131 = vmatpush3.bf16.msra.mxu1 %v1331_v1  ;;  %s1361_s30 = scalar_lea.vmem %s1575_s0, %s1095_s27  ;;  %s246_s9 = scalar_lea.vmem %s1578_s3, %s1063_s19 }
  0x11   : > { %1124 = vmatprep.subr.bf16.mxu0 %v1272_v0  ;;  %1132 = vmatprep.subr.bf16.mxu1 %v1272_v0  ;;  %v264_v4 = vpack.c.bf16 %v258_v3, %v258_v3  ;;  %s262_s6 = scalar_lea.vmem %s1361_s30, %s1067_s5  ;;  %v259_v12 = vld [vmem:[%s246_s9] sm:$0xf] }
  0x12   : > { %v263_v5 = vld [vmem:[%s262_s6] sm:$0xf]  ;;  %s1390_s12 = scalar_select %p253_p4, 6, 1 }
  0x13   : > { %s1413_s18 = scalar_select %p253_p4, 5, 2 }
  0x14   : > { %1125 = vmatpush3.bf16.msra.mxu0 %v1334_v2  ;;  %1133 = vmatpush3.bf16.msra.mxu1 %v1334_v2  ;;  %s1072_s13 = sshll.u32 %s1390_s12, 2 }
  0x15   : > { %1138 = vmatprep.subr.bf16.mxu0 %v1272_v0  ;;  %1146 = vmatprep.subr.bf16.mxu1 %v1272_v0  ;;  %s359_s14 = scalar_lea.vmem %s1361_s30, %s1072_s13  ;;  %s1075_s19 = sshll.u32 %s1413_s18, 2 }
  0x16   : > { %v360_v28 = vld [vmem:[%s359_s14] sm:$0xf]  ;;  %s441_s20 = scalar_lea.vmem %s1361_s30, %s1075_s19 }
  0x17   : > { %1127 = vmatmul.mubr.msk.bf16.vlgmr.msra.gmra.mxu0 %vm277_vm1, %v264_v4  ;;  %v442_v49 = vld [vmem:[%s441_s20] sm:$0xf]  ;;  %s1436_s21 = scalar_select %p253_p4, 4, 3 }
  0x18   : > { %1139 = vmatpush3.bf16.msra.mxu0 %v1331_v1  ;;  %1142 = vmatprep.mubr.msk.bf16.mxu0 %vm1273_vm0, %v1272_v0  ;;  %s1458_s24 = scalar_select %p253_p4, 3, 4 }
  0x19   : > { %1140 = vmatprep.subr.bf16.mxu0 %v1272_v0  ;;  %s1078_s22 = sshll.u32 %s1436_s21, 2 }
  0x1a   : > { %s523_s23 = scalar_lea.vmem %s1361_s30, %s1078_s22  ;;  %s1081_s25 = sshll.u32 %s1458_s24, 2 }
  0x1b   : > { %s605_s28 = scalar_lea.vmem %s1361_s30, %s1081_s25 }
  0x1c   : > { %1141 = vmatpush3.bf16.msra.mxu0 %v1334_v2  ;;  %s1480_s29 = scalar_select %p253_p4, 2, 5 }
  0x1d   : > { %1154 = vmatprep.subr.bf16.mxu0 %v1272_v0  ;;  %s1497_s8 = scalar_select %p253_p4, 1, 6 }
  0x1e   : > { %s1084_s6 = sshll.u32 %s1480_s29, 2 }
  0x1f   : > { %s687_s7 = scalar_lea.vmem %s1361_s30, %s1084_s6  ;;  %s1087_s9 = sshll.u32 %s1497_s8, 2 }
  0x20   : > { %s769_s14 = scalar_lea.vmem %s1361_s30, %s1087_s9 }
  0x21   : > { %s1510_s20 = scalar_select %p253_p4, 0, 7 }
  0xd7   : > { %v315_v6 = vpop.f32.mrf.mxu0 }
  0xd8   : > { %v321_v7 = vadd.f32 %v315_v6, %v263_v5 }
  0xd9   : > { %v1128_v8 = vpop.f32.mrf.mxu0 }
  0xda   : > { %1200 = vtanh.f32 %v321_v7  ;;  %v1071_v13 = vmul.f32 -1.442695, %v321_v7 }
  0xdb   : > { %v318_v9 = vpop.f32.mrf.mxu0 }
  0xdc   : > { %1202 = vpow2.f32 %v1071_v13  ;;  %v524_v9 = vld [vmem:[%s523_s23] sm:$0xf]  ;;  %s1090_s23 = sshll.u32 %s1510_s20, 2 }
  0xdd   : > { %v1129_v10 = vpop.f32.mrf.mxu0 }
  0xe7   : > { %v1201_v11 = vpop.eup %1200 }
  0xe8   : > { %335 = vrot.lane.b32.xlu0 %v1201_v11, %s1274_s10 }
  0xe9   : > { %v1203_v14 = vpop.eup %1202 }
  0xea   : > { %v325_v15 = vadd.f32 1.0, %v1203_v14 }
  0xec   : > { %330 = vrot.lane.b32.xlu0 %v259_v12, %s1275_s11  ;;  %1204 = vrcp.f32 %v325_v15 }
  0xf9   : > { %v1205_v16 = vpop.eup %1204 }
 0x15a   : > { %v336_v17 = vpop.permute.xlu0 %335 }
 0x15b   : > { %v338_v18 = vmul.f32 %v1205_v16, %v336_v17 }
 0x15d   : > { %340 = vrot.lane.b32.xlu1 %v338_v18, %s1275_s11 }
 0x15e   : > { %v331_v19 = vpop.permute.xlu0 %330 }
 0x15f   : > { %v333_v20 = vmul.f32 %v1205_v16, %v331_v19 }
 0x1cf   : > { %v341_v21 = vpop.permute.xlu1 %340 }
 0x1d0   : > { %v343_v22 = vadd.f32 %v341_v21, %v333_v20 }
 0x1d2   : > { %1206 = vtanh.f32 %v343_v22 }
 0x1df   : > { %v1207_v23 = vpop.eup %1206 }
 0x1e0   : > { %346 = vrot.lane.b32.xlu1 %v1207_v23, %s1274_s10 }
 0x252   : > { %v347_v24 = vpop.permute.xlu1 %346 }
 0x253   : > { %v1376_v25 = vmul.f32 %v1205_v16, %v347_v24 }
 0x255   : > { %v361_v26 = vpack.c.bf16 %v1376_v25, %v1376_v25 }
 0x257   : > { %363 = vrot.lane.b32.xlu0 %v361_v26, %s1275_s11 }
 0x2c9   : > { %v364_v27 = vpop.permute.xlu0 %363 }
 0x2ca   : > { %1135 = vmatmul.mubr.msk.bf16.vlgmr.msra.gmra.mxu1 %vm277_vm1, %v364_v27 }
 0x2cb   : > { %1147 = vmatpush3.bf16.msra.mxu1 %v1331_v1  ;;  %1150 = vmatprep.mubr.msk.bf16.mxu1 %vm1273_vm0, %v1272_v0 }
 0x2cc   : > { %1148 = vmatprep.subr.bf16.mxu1 %v1272_v0 }
 0x2cf   : > { %1149 = vmatpush3.bf16.msra.mxu1 %v1334_v2 }
 0x2d0   : > { %1162 = vmatprep.subr.bf16.mxu1 %v1272_v0 }
 0x38a   : > { %v402_v29 = vpop.f32.mrf.mxu1 }
 0x38b   : > { %v408_v30 = vadd.f32 %v402_v29, %v360_v28 }
 0x38c   : > { %v1136_v31 = vpop.f32.mrf.mxu1 }
 0x38d   : > { %1208 = vtanh.f32 %v408_v30  ;;  %v1074_v35 = vmul.f32 -1.442695, %v408_v30  ;;  %v606_v31 = vld [vmem:[%s605_s28] sm:$0xf]  ;;  %s851_s28 = scalar_lea.vmem %s1361_s30, %s1090_s23 }
 0x38e   : > { %v405_v32 = vpop.f32.mrf.mxu1 }
 0x38f   : > { %1210 = vpow2.f32 %v1074_v35 }
 0x390   : > { %v1137_v33 = vpop.f32.mrf.mxu1 }
 0x39a   : > { %v1209_v34 = vpop.eup %1208 }
 0x39b   : > { %418 = vrot.lane.b32.xlu1 %v1209_v34, %s1274_s10 }
 0x39c   : > { %v1211_v36 = vpop.eup %1210 }
 0x39d   : > { %v412_v37 = vadd.f32 1.0, %v1211_v36 }
 0x39f   : > { %1212 = vrcp.f32 %v412_v37 }
 0x3ac   : > { %v1213_v38 = vpop.eup %1212 }
 0x3ad   : > { %v416_v41 = vmul.f32 %v1213_v38, %v343_v22 }
 0x40d   : > { %v419_v39 = vpop.permute.xlu1 %418 }
 0x40e   : > { %v421_v40 = vmul.f32 %v1213_v38, %v419_v39 }
 0x410   : > { %423 = vrot.lane.b32.xlu0 %v421_v40, %s1275_s11 }
 0x482   : > { %v424_v42 = vpop.permute.xlu0 %423 }
 0x483   : > { %v426_v43 = vadd.f32 %v424_v42, %v416_v41 }
 0x485   : > { %1214 = vtanh.f32 %v426_v43 }
 0x492   : > { %v1215_v44 = vpop.eup %1214 }
 0x493   : > { %429 = vrot.lane.b32.xlu1 %v1215_v44, %s1274_s10 }
 0x505   : > { %v430_v45 = vpop.permute.xlu1 %429 }
 0x506   : > { %v1399_v46 = vmul.f32 %v1213_v38, %v430_v45 }
 0x508   : > { %v443_v47 = vpack.c.bf16 %v1399_v46, %v1399_v46 }
 0x50a   : > { %445 = vrot.lane.b32.xlu0 %v443_v47, %s1275_s11 }
 0x57c   : > { %v446_v48 = vpop.permute.xlu0 %445 }
 0x57d   : > { %1143 = vmatmul.mubr.msk.bf16.vlgmr.msra.gmra.mxu0 %vm277_vm1, %v446_v48 }
 0x57e   : > { %1155 = vmatpush3.bf16.msra.mxu0 %v1331_v1  ;;  %1158 = vmatprep.mubr.msk.bf16.mxu0 %vm1273_vm0, %v1272_v0 }
 0x57f   : > { %1156 = vmatprep.subr.bf16.mxu0 %v1272_v0 }
 0x582   : > { %1157 = vmatpush3.bf16.msra.mxu0 %v1334_v2 }
 0x583   : > { %1170 = vmatprep.subr.bf16.mxu0 %v1272_v0 }
 0x63d   : > { %v484_v50 = vpop.f32.mrf.mxu0 }
 0x63e   : > { %v490_v51 = vadd.f32 %v484_v50, %v442_v49 }
 0x63f   : > { %v1144_v52 = vpop.f32.mrf.mxu0 }
 0x640   : > { %1216 = vtanh.f32 %v490_v51  ;;  %v1077_v56 = vmul.f32 -1.442695, %v490_v51 }
 0x641   : > { %v487_v53 = vpop.f32.mrf.mxu0 }
 0x642   : > { %1218 = vpow2.f32 %v1077_v56  ;;  %v688_v53 = vld [vmem:[%s687_s7] sm:$0xf]  ;;  %s1530_s7 = scalar_lea.vmem %s1579_s4, %s1095_s27 }
 0x643   : > { %v1145_v54 = vpop.f32.mrf.mxu0  ;;  %s437_s17 = scalar_lea.vmem %s1530_s7, %s1072_s13  ;;  %s519_s26 = scalar_lea.vmem %s1530_s7, %s1075_s19 }
 0x644   : > { %s601_s27 = scalar_lea.vmem %s1530_s7, %s1078_s22  ;;  %s929_s12 = scalar_lea.vmem %s1530_s7, %s1090_s23 }
 0x64d   : > { %v1217_v55 = vpop.eup %1216 }
 0x64e   : > { %500 = vrot.lane.b32.xlu1 %v1217_v55, %s1274_s10 }
 0x64f   : > { %v1219_v57 = vpop.eup %1218 }
 0x650   : > { %v494_v58 = vadd.f32 1.0, %v1219_v57 }
 0x652   : > { %1220 = vrcp.f32 %v494_v58 }
 0x65f   : > { %v1221_v59 = vpop.eup %1220 }
 0x660   : > { %v498_v62 = vmul.f32 %v1221_v59, %v426_v43 }
 0x6c0   : > { %v501_v60 = vpop.permute.xlu1 %500 }
 0x6c1   : > { %v503_v61 = vmul.f32 %v1221_v59, %v501_v60 }
 0x6c3   : > { %505 = vrot.lane.b32.xlu0 %v503_v61, %s1275_s11 }
 0x735   : > { %v506_v63 = vpop.permute.xlu0 %505 }
 0x736   : > { %v508_v3 = vadd.f32 %v506_v63, %v498_v62 }
 0x738   : > { %1222 = vtanh.f32 %v508_v3 }
 0x745   : > { %v1223_v4 = vpop.eup %1222 }
 0x746   : > { %511 = vrot.lane.b32.xlu1 %v1223_v4, %s1274_s10 }
 0x7b8   : > { %v512_v5 = vpop.permute.xlu1 %511 }
 0x7b9   : > { %v1422_v6 = vmul.f32 %v1221_v59, %v512_v5 }
 0x7bb   : > { %v525_v7 = vpack.c.bf16 %v1422_v6, %v1422_v6 }
 0x7bd   : > { %527 = vrot.lane.b32.xlu0 %v525_v7, %s1275_s11 }
 0x82f   : > { %v528_v8 = vpop.permute.xlu0 %527 }
 0x830   : > { %1151 = vmatmul.mubr.msk.bf16.vlgmr.msra.gmra.mxu1 %vm277_vm1, %v528_v8 }
 0x831   : > { %1163 = vmatpush3.bf16.msra.mxu1 %v1331_v1  ;;  %1166 = vmatprep.mubr.msk.bf16.mxu1 %vm1273_vm0, %v1272_v0 }
 0x832   : > { %1164 = vmatprep.subr.bf16.mxu1 %v1272_v0 }
 0x835   : > { %1165 = vmatpush3.bf16.msra.mxu1 %v1334_v2 }
 0x836   : > { %1178 = vmatprep.subr.bf16.mxu1 %v1272_v0 }
 0x8f0   : > { %v566_v10 = vpop.f32.mrf.mxu1 }
 0x8f1   : > { %v572_v11 = vadd.f32 %v566_v10, %v524_v9 }
 0x8f2   : > { %v1152_v12 = vpop.f32.mrf.mxu1 }
 0x8f3   : > { %1224 = vtanh.f32 %v572_v11  ;;  %v1080_v16 = vmul.f32 -1.442695, %v572_v11  ;;  %v770_v11 = vld [vmem:[%s769_s14] sm:$0xf]  ;;  %s354_s14 = scalar_lea.vmem %s1530_s7, %s1067_s5  ;;  %s683_s5 = scalar_lea.vmem %s1530_s7, %s1081_s25 }
 0x8f4   : > { %v569_v13 = vpop.f32.mrf.mxu1 }
 0x8f5   : > { %1226 = vpow2.f32 %v1080_v16 }
 0x8f6   : > { %v1153_v14 = vpop.f32.mrf.mxu1 }
 0x900   : > { %v1225_v15 = vpop.eup %1224 }
 0x901   : > { %582 = vrot.lane.b32.xlu1 %v1225_v15, %s1274_s10 }
 0x902   : > { %v1227_v17 = vpop.eup %1226 }
 0x903   : > { %v576_v18 = vadd.f32 1.0, %v1227_v17 }
 0x905   : > { %1228 = vrcp.f32 %v576_v18 }
 0x912   : > { %v1229_v19 = vpop.eup %1228 }
 0x913   : > { %v580_v22 = vmul.f32 %v1229_v19, %v508_v3 }
 0x973   : > { %v583_v20 = vpop.permute.xlu1 %582 }
 0x974   : > { %v585_v21 = vmul.f32 %v1229_v19, %v583_v20 }
 0x976   : > { %587 = vrot.lane.b32.xlu0 %v585_v21, %s1275_s11 }
 0x9e8   : > { %v588_v23 = vpop.permute.xlu0 %587 }
 0x9e9   : > { %v590_v24 = vadd.f32 %v588_v23, %v580_v22 }
 0x9eb   : > { %1230 = vtanh.f32 %v590_v24 }
 0x9f8   : > { %v1231_v26 = vpop.eup %1230 }
 0x9f9   : > { %593 = vrot.lane.b32.xlu1 %v1231_v26, %s1274_s10 }
 0xa6b   : > { %v594_v27 = vpop.permute.xlu1 %593 }
 0xa6c   : > { %v1445_v28 = vmul.f32 %v1229_v19, %v594_v27 }
 0xa6e   : > { %v607_v29 = vpack.c.bf16 %v1445_v28, %v1445_v28 }
 0xa70   : > { %609 = vrot.lane.b32.xlu0 %v607_v29, %s1275_s11 }
 0xae2   : > { %v610_v30 = vpop.permute.xlu0 %609 }
 0xae3   : > { %1159 = vmatmul.mubr.msk.bf16.vlgmr.msra.gmra.mxu0 %vm277_vm1, %v610_v30 }
 0xae4   : > { %1171 = vmatpush3.bf16.msra.mxu0 %v1331_v1  ;;  %1174 = vmatprep.mubr.msk.bf16.mxu0 %vm1273_vm0, %v1272_v0 }
 0xae5   : > { %1172 = vmatprep.subr.bf16.mxu0 %v1272_v0 }
 0xae8   : > { %1173 = vmatpush3.bf16.msra.mxu0 %v1334_v2 }
 0xba3   : > { %v648_v32 = vpop.f32.mrf.mxu0 }
 0xba4   : > { %v654_v33 = vadd.f32 %v648_v32, %v606_v31 }
 0xba5   : > { %v1160_v34 = vpop.f32.mrf.mxu0 }
 0xba6   : > { %1232 = vtanh.f32 %v654_v33  ;;  %v1083_v38 = vmul.f32 -1.442695, %v654_v33  ;;  %v852_v34 = vld [vmem:[%s851_s28] sm:$0xf] }
 0xba7   : > { %v651_v35 = vpop.f32.mrf.mxu0 }
 0xba8   : > { %1234 = vpow2.f32 %v1083_v38 }
 0xba9   : > { %v1161_v36 = vpop.f32.mrf.mxu0 }
 0xbb3   : > { %v1233_v37 = vpop.eup %1232 }
 0xbb4   : > { %664 = vrot.lane.b32.xlu1 %v1233_v37, %s1274_s10 }
 0xbb5   : > { %v1235_v39 = vpop.eup %1234 }
 0xbb6   : > { %v658_v40 = vadd.f32 1.0, %v1235_v39 }
 0xbb8   : > { %1236 = vrcp.f32 %v658_v40 }
 0xbc5   : > { %v1237_v41 = vpop.eup %1236 }
 0xbc6   : > { %v662_v44 = vmul.f32 %v1237_v41, %v590_v24 }
 0xc26   : > { %v665_v42 = vpop.permute.xlu1 %664 }
 0xc27   : > { %v667_v43 = vmul.f32 %v1237_v41, %v665_v42 }
 0xc29   : > { %669 = vrot.lane.b32.xlu0 %v667_v43, %s1275_s11 }
 0xc9b   : > { %v670_v45 = vpop.permute.xlu0 %669 }
 0xc9c   : > { %v672_v47 = vadd.f32 %v670_v45, %v662_v44 }
 0xc9e   : > { %1238 = vtanh.f32 %v672_v47 }
 0xcab   : > { %v1239_v48 = vpop.eup %1238 }
 0xcac   : > { %675 = vrot.lane.b32.xlu1 %v1239_v48, %s1274_s10 }
 0xd1e   : > { %v676_v49 = vpop.permute.xlu1 %675 }
 0xd1f   : > { %v1467_v50 = vmul.f32 %v1237_v41, %v676_v49 }
 0xd21   : > { %v689_v51 = vpack.c.bf16 %v1467_v50, %v1467_v50 }
 0xd23   : > { %691 = vrot.lane.b32.xlu0 %v689_v51, %s1275_s11 }
 0xd95   : > { %v692_v52 = vpop.permute.xlu0 %691 }
 0xd96   : > { %1167 = vmatmul.mubr.msk.bf16.vlgmr.msra.gmra.mxu1 %vm277_vm1, %v692_v52 }
 0xd97   : > { %1179 = vmatpush3.bf16.msra.mxu1 %v1331_v1  ;;  %1182 = vmatprep.mubr.msk.bf16.mxu1 %vm1273_vm0, %v1272_v0 }
 0xd98   : > { %1180 = vmatprep.subr.bf16.mxu1 %v1272_v0 }
 0xd9b   : > { %1181 = vmatpush3.bf16.msra.mxu1 %v1334_v2 }
 0xe56   : > { %v730_v54 = vpop.f32.mrf.mxu1 }
 0xe57   : > { %v736_v55 = vadd.f32 %v730_v54, %v688_v53 }
 0xe58   : > { %v1168_v56 = vpop.f32.mrf.mxu1 }
 0xe59   : > { %1240 = vtanh.f32 %v736_v55  ;;  %v1086_v0 = vmul.f32 -1.442695, %v736_v55 }
 0xe5a   : > { %v733_v1 = vpop.f32.mrf.mxu1 }
 0xe5b   : > { %1242 = vpow2.f32 %v1086_v0 }
 0xe5c   : > { %v1169_v57 = vpop.f32.mrf.mxu1 }
 0xe66   : > { %v1241_v58 = vpop.eup %1240 }
 0xe67   : > { %746 = vrot.lane.b32.xlu1 %v1241_v58, %s1274_s10 }
 0xe68   : > { %v1243_v2 = vpop.eup %1242 }
 0xe69   : > { %v740_v59 = vadd.f32 1.0, %v1243_v2 }
 0xe6b   : > { %1244 = vrcp.f32 %v740_v59 }
 0xe78   : > { %v1245_v60 = vpop.eup %1244 }
 0xe79   : > { %v744_v63 = vmul.f32 %v1245_v60, %v672_v47 }
 0xed9   : > { %v747_v61 = vpop.permute.xlu1 %746 }
 0xeda   : > { %v749_v62 = vmul.f32 %v1245_v60, %v747_v61 }
 0xedc   : > { %751 = vrot.lane.b32.xlu0 %v749_v62, %s1275_s11 }
 0xf4e   : > { %v752_v3 = vpop.permute.xlu0 %751 }
 0xf4f   : > { %v754_v4 = vadd.f32 %v752_v3, %v744_v63 }
 0xf51   : > { %1246 = vtanh.f32 %v754_v4 }
 0xf5e   : > { %v1247_v5 = vpop.eup %1246 }
 0xf5f   : > { %757 = vrot.lane.b32.xlu1 %v1247_v5, %s1274_s10 }
 0xfd1   : > { %v758_v7 = vpop.permute.xlu1 %757 }
 0xfd2   : > { %v1489_v8 = vmul.f32 %v1245_v60, %v758_v7 }
 0xfd4   : > { %v771_v9 = vpack.c.bf16 %v1489_v8, %v1489_v8 }
 0xfd6   : > { %773 = vrot.lane.b32.xlu0 %v771_v9, %s1275_s11 }
0x1048   : > { %v774_v10 = vpop.permute.xlu0 %773 }
0x1049   : > { %1175 = vmatmul.mubr.msk.bf16.vlgmr.msra.gmra.mxu0 %vm277_vm1, %v774_v10 }
0x1109   : > { %v812_v12 = vpop.f32.mrf.mxu0 }
0x110a   : > { %v818_v13 = vadd.f32 %v812_v12, %v770_v11 }
0x110b   : > { %v1176_v14 = vpop.f32.mrf.mxu0 }
0x110c   : > { %1248 = vtanh.f32 %v818_v13  ;;  %v1089_v18 = vmul.f32 -1.442695, %v818_v13 }
0x110d   : > { %v815_v15 = vpop.f32.mrf.mxu0 }
0x110e   : > { %1250 = vpow2.f32 %v1089_v18 }
0x110f   : > { %v1177_v16 = vpop.f32.mrf.mxu0 }
0x1119   : > { %v1249_v17 = vpop.eup %1248 }
0x111a   : > { %828 = vrot.lane.b32.xlu1 %v1249_v17, %s1274_s10 }
0x111b   : > { %v1251_v19 = vpop.eup %1250 }
0x111c   : > { %v822_v20 = vadd.f32 1.0, %v1251_v19 }
0x111e   : > { %1252 = vrcp.f32 %v822_v20 }
0x112b   : > { %v1253_v21 = vpop.eup %1252 }
0x112c   : > { %v826_v24 = vmul.f32 %v1253_v21, %v754_v4 }
0x118c   : > { %v829_v22 = vpop.permute.xlu1 %828 }
0x118d   : > { %v831_v23 = vmul.f32 %v1253_v21, %v829_v22 }
0x118f   : > { %833 = vrot.lane.b32.xlu0 %v831_v23, %s1275_s11 }
0x1201   : > { %v834_v26 = vpop.permute.xlu0 %833 }
0x1202   : > { %v836_v27 = vadd.f32 %v834_v26, %v826_v24 }
0x1204   : > { %1254 = vtanh.f32 %v836_v27 }
0x1211   : > { %v1255_v29 = vpop.eup %1254 }
0x1212   : > { %839 = vrot.lane.b32.xlu1 %v1255_v29, %s1274_s10 }
0x1284   : > { %v840_v30 = vpop.permute.xlu1 %839 }
0x1285   : > { %v842_v31 = vmul.f32 %v1253_v21, %v840_v30 }
0x1287   : > { %v853_v32 = vpack.c.bf16 %v842_v31, %v842_v31 }
0x1289   : > { %855 = vrot.lane.b32.xlu0 %v853_v32, %s1275_s11 }
0x12fb   : > { %v856_v33 = vpop.permute.xlu0 %855 }
0x12fc   : > { %1183 = vmatmul.mubr.msk.bf16.vlgmr.msra.gmra.mxu1 %vm277_vm1, %v856_v33 }
0x13bc   : > { %v894_v35 = vpop.f32.mrf.mxu1 }
0x13bd   : > { %v900_v36 = vadd.f32 %v894_v35, %v852_v34 }
0x13be   : > { %v1184_v37 = vpop.f32.mrf.mxu1 }
0x13bf   : > { %1256 = vtanh.f32 %v900_v36  ;;  %v1092_v41 = vmul.f32 -1.442695, %v900_v36 }
0x13c0   : > { %v897_v38 = vpop.f32.mrf.mxu1 }
0x13c1   : > { %1258 = vpow2.f32 %v1092_v41 }
0x13c2   : > { %v1185_v39 = vpop.f32.mrf.mxu1 }
0x13cc   : > { %v1257_v40 = vpop.eup %1256 }
0x13cd   : > { %910 = vrot.lane.b32.xlu1 %v1257_v40, %s1274_s10 }
0x13ce   : > { %v1259_v42 = vpop.eup %1258 }
0x13cf   : > { %v904_v43 = vadd.f32 1.0, %v1259_v42 }
0x13d1   : > { %1260 = vrcp.f32 %v904_v43 }
0x13de   : > { %v1261_v44 = vpop.eup %1260 }
0x13df   : > { %v908_v48 = vmul.f32 %v1261_v44, %v836_v27 }
0x143f   : > { %v911_v45 = vpop.permute.xlu1 %910 }
0x1440   : > { %v913_v47 = vmul.f32 %v1261_v44, %v911_v45 }
0x1442   : > { %915 = vrot.lane.b32.xlu0 %v913_v47, %s1275_s11 }
0x1446   : > { %351 = vrot.lane.b32.xlu0 %v1376_v25, %s1275_s11 }
0x144a   : > { %516 = vrot.lane.b32.xlu0 %v1422_v6, %s1275_s11 }
0x144e   : > { %680 = vrot.lane.b32.xlu0 %v1467_v50, %s1275_s11 }
0x1452   : > { %844 = vrot.lane.b32.xlu0 %v842_v31, %s1275_s11 }
0x14b4   : > { %v916_v49 = vpop.permute.xlu0 %915 }
0x14b5   : > { %v918_v25 = vadd.f32 %v916_v49, %v908_v48 }
0x14b7   : > { %1262 = vtanh.f32 %v918_v25 }
0x14b8   : > { %v352_v6 = vpop.permute.xlu0 %351 }
0x14b9   : > { %356 = vst.msk [vmem:[%s354_s14] sm:$0xf] %vm355_vm2, %v352_v6 }
0x14bc   : > { %v517_v52 = vpop.permute.xlu0 %516 }
0x14c4   : > { %v1263_v50 = vpop.eup %1262 }
0x14c5   : > { %921 = vrot.lane.b32.xlu1 %v1263_v50, %s1274_s10  ;;  %s765_s10 = scalar_lea.vmem %s1530_s7, %s1084_s6 }
0x14c9   : > { %434 = vrot.lane.b32.xlu1 %v1399_v46, %s1275_s11 }
0x14cd   : > { %598 = vrot.lane.b32.xlu1 %v1445_v28, %s1275_s11  ;;  %v681_v28 = vpop.permute.xlu0 %680 }
0x14d1   : > { %762 = vrot.lane.b32.xlu1 %v1489_v8, %s1275_s11  ;;  %v845_v56 = vpop.permute.xlu0 %844 }
0x1537   : > { %v922_v51 = vpop.permute.xlu1 %921 }
0x1538   : > { %v924_v53 = vmul.f32 %v1261_v44, %v922_v51 }
0x153a   : > { %926 = vrot.lane.b32.xlu1 %v924_v53, %s1275_s11  ;;  %s847_s11 = scalar_lea.vmem %s1530_s7, %s1087_s9 }
0x153b   : > { %v435_v46 = vpop.permute.xlu1 %434 }
0x153c   : > { %438 = vst.msk [vmem:[%s437_s17] sm:$0xf] %vm355_vm2, %v435_v46 }
0x153d   : > { %520 = vst.msk [vmem:[%s519_s26] sm:$0xf] %vm355_vm2, %v517_v52 }
0x153f   : > { %v599_v54 = vpop.permute.xlu1 %598 }
0x1540   : > { %602 = vst.msk [vmem:[%s601_s27] sm:$0xf] %vm355_vm2, %v599_v54 }
0x1541   : > { %684 = vst.msk [vmem:[%s683_s5] sm:$0xf] %vm355_vm2, %v681_v28 }
0x1543   : > { %v763_v55 = vpop.permute.xlu1 %762 }
0x1544   : > { %766 = vst.msk [vmem:[%s765_s10] sm:$0xf] %vm355_vm2, %v763_v55 }
0x1545   : > { %848 = vst.msk [vmem:[%s847_s11] sm:$0xf] %vm355_vm2, %v845_v56 }
0x15ac   : > { %v927_v1 = vpop.permute.xlu1 %926 }
0x15ad   : > { %930 = vst.msk [vmem:[%s929_s12] sm:$0xf] %vm355_vm2, %v927_v1 }
0x15ae PF: > { %s14_s15 = sadd.s32 1, %s1270_s15  }
0x15af   : > { %p11_p5 = scmp.ge.s32.totalorder %s14_s15, 4  }
0x15b1   :  { %13 = sbr.rel (!%p11_p5) target bundleno = 1 (0x1), region = 91 }

</bundles_post_ra>
